<compile_context>
chip_gen: v7x
topology: tpu7x:2x2x1
jax: 0.10.0
libtpu: 0.0.40
codegen_flags: <defaults>
</compile_context>

<pallas_src>
import jax
import jax.numpy as jnp
from jax.experimental import pallas as pl
from jax.experimental.pallas import tpu as pltpu

PAD_TOKEN_ID = 0  # T5Tokenizer.pad_token_id


def _ce_scores_kernel(logits_ref, target_ref, scores_ref, loss_ref):
    """logits_ref: (TM, V); target_ref/scores_ref: (TM, 1); loss_ref: (1, 1, TM)."""
    logits = logits_ref[...].astype(jnp.float32)            # (TM, V) f32 math
    tgt = target_ref[...]                                    # (TM, 1) int32
    tm = logits.shape[0]

    # Numerically stable log-softmax pieces; `shifted` is reused for both the
    # exp/sum and the target pick (the row max cancels in the nll).
    m = jnp.max(logits, axis=-1, keepdims=True)              # (TM, 1)
    shifted = logits - m                                      # (TM, V)
    sumexp = jnp.sum(jnp.exp(shifted), axis=-1, keepdims=True)   # (TM, 1)

    col = jax.lax.broadcasted_iota(jnp.int32, shifted.shape, 1)
    picked = jnp.sum(jnp.where(col == tgt, shifted, 0.0), axis=-1, keepdims=True)

    nll = jnp.log(sumexp) - picked                            # (TM, 1)
    # ignore_index (pad rows) -> 0, fused with the (scores + 20) weighting.
    w = jnp.where(tgt == PAD_TOKEN_ID, 0.0, scores_ref[...] + 20.0)
    weighted = nll * w                                        # (TM, 1)

    # Lane-dense output: scatter the per-row column vector onto a diagonal of a
    # (TM, TM) tile and reduce over sublanes -> (1, TM) row vector.  Avoids a
    # sublane->lane relayout and replaces TM/8 masked column stores with a few
    # wide row stores.
    r = jax.lax.broadcasted_iota(jnp.int32, (tm, tm), 0)
    c = jax.lax.broadcasted_iota(jnp.int32, (tm, tm), 1)
    row_vals = jnp.sum(jnp.where(r == c, weighted, 0.0), axis=0, keepdims=True)
    loss_ref[0, :, :] = row_vals


def _round_up(x, m):
    return ((x + m - 1) // m) * m


def cross_entropy_scores_loss(logits, scores, target, *, tile_rows=None,
                              vmem_limit_bytes=None):
    """logits: [B, S, V]; scores: [B]; target: [B, S] int. Returns [B*S] f32."""
    B, S, V = logits.shape
    N = B * S
    itemsize = jnp.dtype(logits.dtype).itemsize
    # Sublane packing granule: 8 rows for 4-byte dtypes, 16 for bf16, 32 for 1-byte.
    granule = max(8, 32 // max(itemsize, 1))

    if vmem_limit_bytes is None:
        try:
            cap = int(pltpu.get_tpu_info().vmem_capacity_bytes)
        except Exception:
            cap = 64 * 1024 * 1024  # conservative fallback (v7x per-core VMEM)
        # ~3/4 of physical VMEM, capped: 96 MiB on v5e/v6e, ~48 MiB on v7x.
        vmem_limit_bytes = min(cap * 3 // 4, 96 * 1024 * 1024)
    vmem_limit_bytes = int(vmem_limit_bytes)

    if tile_rows is None:
        # Budget: double-buffered input block (2*itemsize) plus ~3 whole-block f32
        # temporaries (upcast / exp / masked pick) inside the kernel.
        bytes_per_row = V * (2 * itemsize + 12)
        tile_rows = (vmem_limit_bytes * 7 // 10) // max(bytes_per_row, 1)
        tile_rows = max(granule, min(int(tile_rows), 1024))
    tile_rows = max(granule, (int(tile_rows) // granule) * granule)
    tile_rows = min(tile_rows, _round_up(N, granule))

    N_pad = _round_up(N, tile_rows)
    G = N_pad // tile_rows

    logits2 = logits.reshape(N, V)
    target2 = target.reshape(N).astype(jnp.int32)
    # torch.Tensor.repeat on a 1-D tensor tiles the whole tensor (NOT repeat_interleave).
    scores_rep = jnp.tile(scores.astype(jnp.float32), N // B)

    if N_pad != N:
        pad = N_pad - N
        logits2 = jnp.pad(logits2, ((0, pad), (0, 0)))
        target2 = jnp.pad(target2, (0, pad), constant_values=PAD_TOKEN_ID)  # loss 0
        scores_rep = jnp.pad(scores_rep, (0, pad))

    target2 = target2.reshape(N_pad, 1)
    scores_rep = scores_rep.reshape(N_pad, 1)

    out = pl.pallas_call(
        _ce_scores_kernel,
        out_shape=jax.ShapeDtypeStruct((G, 1, tile_rows), jnp.float32),
        grid_spec=pltpu.PrefetchScalarGridSpec(
            num_scalar_prefetch=0,
            grid=(G,),
            in_specs=[
                pl.BlockSpec((tile_rows, V), lambda i: (i, 0)),
                pl.BlockSpec((tile_rows, 1), lambda i: (i, 0)),
                pl.BlockSpec((tile_rows, 1), lambda i: (i, 0)),
            ],
            out_specs=pl.BlockSpec((1, 1, tile_rows), lambda i: (i, 0, 0)),
        ),
        compiler_params=pltpu.CompilerParams(
            dimension_semantics=("parallel",),
            vmem_limit_bytes=vmem_limit_bytes,
        ),
    )(logits2, target2, scores_rep)
    return out.reshape(N_pad)[:N]


if __name__ == "__main__":
    key = jax.random.PRNGKey(0)
    B, S, V = 2, 8, 128
    k1, k2, k3 = jax.random.split(key, 3)

    logits = jax.random.normal(k1, (B, S, V), dtype=jnp.float32)
    target = jax.random.randint(k2, (B, S), 0, V, dtype=jnp.int32)
    # Force a couple of pad positions so ignore_index is exercised.
    target = target.at[0, 0].set(PAD_TOKEN_ID).at[1, 3].set(PAD_TOKEN_ID)
    scores = jax.random.normal(k3, (B,), dtype=jnp.float32)

    def reference(lg, sc, tg):
        Bb, Ss, Vv = lg.shape
        Nn = Bb * Ss
        logp = jax.nn.log_softmax(lg.reshape(Nn, Vv).astype(jnp.float32), axis=-1)
        nll = -jnp.take_along_axis(logp, tg.reshape(Nn, 1), axis=-1)[:, 0]
        nll = jnp.where(tg.reshape(Nn) == PAD_TOKEN_ID, 0.0, nll)
        return nll * (jnp.tile(sc.astype(jnp.float32), Nn // Bb) + 20.0)

    # f32 logits path.
    loss = cross_entropy_scores_loss(logits, scores, target)
    jax.block_until_ready(loss)
    expected = reference(logits, scores, target)
    assert loss.shape == (B * S,)
    assert jnp.allclose(loss, expected, atol=1e-4, rtol=1e-4)

    # bf16 logits path (halved HBM traffic); math is still f32 inside the kernel.
    logits_bf16 = logits.astype(jnp.bfloat16)
    loss_bf16 = cross_entropy_scores_loss(logits_bf16, scores, target)
    jax.block_until_ready(loss_bf16)
    expected_bf16 = reference(logits_bf16.astype(jnp.float32), scores, target)
    assert jnp.allclose(loss_bf16, expected_bf16, atol=1e-3, rtol=1e-3)

    print("KERNEL_OK")
</pallas_src>

<mosaic_0001>
module attributes {stable_mosaic.version = 11 : i64} {
  func.func @_ce_scores_kernel(%arg0: i32, %arg1: memref<16x128xf32, #tpu.memory_space<vmem>>, %arg2: memref<16x1xi32, #tpu.memory_space<vmem>>, %arg3: memref<16x1xf32, #tpu.memory_space<vmem>>, %arg4: memref<1x1x16xf32, #tpu.memory_space<vmem>>) attributes {dimension_semantics = [#tpu.dimension_semantics<parallel>], iteration_bounds = array<i64: 1>, scalar_prefetch = 0 : i64, scratch_operands = 0 : i64, tpu.core_type = #tpu.core_type<tc>, window_params = [{transform_indices = @transform_0, window_bounds = array<i64: 16, 128>}, {transform_indices = @transform_1, window_bounds = array<i64: 16, 1>}, {transform_indices = @transform_2, window_bounds = array<i64: 16, 1>}, {transform_indices = @transform_3, window_bounds = array<i64: 1, 1, 16>}]} {
    %c0 = arith.constant 0 : index
    %c0_0 = arith.constant 0 : index
    %0 = vector.load %arg1[%c0, %c0_0] : memref<16x128xf32, #tpu.memory_space<vmem>>, vector<16x128xf32>
    %c0_1 = arith.constant 0 : index
    %c0_2 = arith.constant 0 : index
    %1 = vector.load %arg2[%c0_1, %c0_2] : memref<16x1xi32, #tpu.memory_space<vmem>>, vector<16x1xi32>
    %cst = arith.constant dense<0xFF800000> : vector<16xf32>
    %2 = vector.multi_reduction <maximumf>, %0, %cst [1] : vector<16x128xf32> to vector<16xf32>
    %3 = vector.shape_cast %2 : vector<16xf32> to vector<16x1xf32>
    %4 = vector.broadcast %3 : vector<16x1xf32> to vector<16x128xf32>
    %5 = arith.subf %0, %4 : vector<16x128xf32>
    %6 = math.exp %5 : vector<16x128xf32>
    %cst_3 = arith.constant dense<0.000000e+00> : vector<16xf32>
    %7 = vector.multi_reduction <add>, %6, %cst_3 [1] : vector<16x128xf32> to vector<16xf32>
    %8 = vector.shape_cast %7 : vector<16xf32> to vector<16x1xf32>
    %9 = tpu.iota {dimensions = array<i32: 1>} : vector<16x128xi32>
    %10 = vector.broadcast %1 : vector<16x1xi32> to vector<16x128xi32>
    %11 = arith.cmpi eq, %9, %10 : vector<16x128xi32>
    %cst_4 = arith.constant 0.000000e+00 : f32
    %12 = vector.broadcast %cst_4 : f32 to vector<16x128xf32>
    %13 = arith.select %11, %5, %12 : vector<16x128xi1>, vector<16x128xf32>
    %cst_5 = arith.constant dense<0.000000e+00> : vector<16xf32>
    %14 = vector.multi_reduction <add>, %13, %cst_5 [1] : vector<16x128xf32> to vector<16xf32>
    %15 = vector.shape_cast %14 : vector<16xf32> to vector<16x1xf32>
    %16 = math.log %8 : vector<16x1xf32>
    %17 = arith.subf %16, %15 : vector<16x1xf32>
    %c0_i32 = arith.constant 0 : i32
    %18 = vector.broadcast %c0_i32 : i32 to vector<16x1xi32>
    %19 = arith.cmpi eq, %1, %18 : vector<16x1xi32>
    %c0_6 = arith.constant 0 : index
    %c0_7 = arith.constant 0 : index
    %20 = vector.load %arg3[%c0_6, %c0_7] : memref<16x1xf32, #tpu.memory_space<vmem>>, vector<16x1xf32>
    %cst_8 = arith.constant 2.000000e+01 : f32
    %21 = vector.broadcast %cst_8 : f32 to vector<16x1xf32>
    %22 = arith.addf %20, %21 : vector<16x1xf32>
    %cst_9 = arith.constant 0.000000e+00 : f32
    %23 = vector.broadcast %cst_9 : f32 to vector<16x1xf32>
    %24 = arith.select %19, %23, %22 : vector<16x1xi1>, vector<16x1xf32>
    %25 = arith.mulf %17, %24 : vector<16x1xf32>
    %26 = tpu.iota {dimensions = array<i32: 0>} : vector<16x16xi32>
    %27 = tpu.iota {dimensions = array<i32: 1>} : vector<16x16xi32>
    %28 = arith.cmpi eq, %26, %27 : vector<16x16xi32>
    %cst_10 = arith.constant 0.000000e+00 : f32
    %29 = vector.shape_cast %25 : vector<16x1xf32> to vector<16x1xf32>
    %30 = vector.broadcast %29 : vector<16x1xf32> to vector<16x16xf32>
    %31 = vector.broadcast %cst_10 : f32 to vector<16x16xf32>
    %32 = arith.select %28, %30, %31 : vector<16x16xi1>, vector<16x16xf32>
    %cst_11 = arith.constant dense<0.000000e+00> : vector<16xf32>
    %33 = vector.multi_reduction <add>, %32, %cst_11 [0] : vector<16x16xf32> to vector<16xf32>
    %34 = vector.shape_cast %33 : vector<16xf32> to vector<1x16xf32>
    %c0_12 = arith.constant 0 : index
    %c0_13 = arith.constant 0 : index
    %c0_14 = arith.constant 0 : index
    %35 = vector.load %arg4[%c0_12, %c0_13, %c0_14] : memref<1x1x16xf32, #tpu.memory_space<vmem>>, vector<1x1x16xf32>
    %36 = vector.shape_cast %35 : vector<1x1x16xf32> to vector<1x16xf32>
    %37 = vector.shape_cast %34 : vector<1x16xf32> to vector<1x1x16xf32>
    tpu.vector_store %arg4[%c0_12, %c0_13, %c0_14], %37 {strides = array<i32>} : memref<1x1x16xf32, #tpu.memory_space<vmem>>, vector<1x1x16xf32>,
    return
  }
  func.func @transform_0(%arg0: i32) -> (i32, i32) {
    %c0_i32 = arith.constant 0 : i32
    %c0_i32_0 = arith.constant 0 : i32
    return %arg0, %c0_i32 : i32, i32
  }
  func.func @transform_1(%arg0: i32) -> (i32, i32) {
    %c0_i32 = arith.constant 0 : i32
    %c0_i32_0 = arith.constant 0 : i32
    return %arg0, %c0_i32 : i32, i32
  }
  func.func @transform_2(%arg0: i32) -> (i32, i32) {
    %c0_i32 = arith.constant 0 : i32
    %c0_i32_0 = arith.constant 0 : i32
    return %arg0, %c0_i32 : i32, i32
  }
  func.func @transform_3(%arg0: i32) -> (i32, i32, i32) {
    %c0_i32 = arith.constant 0 : i32
    %c0_i32_0 = arith.constant 0 : i32
    %c0_i32_1 = arith.constant 0 : i32
    return %arg0, %c0_i32, %c0_i32_0 : i32, i32, i32
  }
}

</mosaic_0001>

<bundles_post_ra>
// kernel: tpu_custom_call.1
= control target key start
LH: loop header
LB: loop body
LE: loop exit
PB: predicated region body
PF: predicated region fallthrough
CT: control target
= control target key end

     0   :  { %v144_v2 = vmov 0   ;;  %s196_s0 = inlined_call_operand.vmem [shape: f32[16,128], index: 0, kind: input, shape index: {}]   ;;  %s197_s1 = inlined_call_operand.vmem [shape: s32[16,1], index: 1, kind: input, shape index: {}]   ;;  %s198_s2 = inlined_call_operand.vmem [shape: f32[16,1], index: 2, kind: input, shape index: {}]   ;;  %s199_s3 = inlined_call_operand.hbm [shape: f32[1,1,16], index: 3, kind: output, shape index: {}]  }
   0x1   :  { %v15_v0 = vld [vmem:[%s196_s0] sm:$0xff]  ;;  %110 = vset.pattern.permute.xlu1 %v144_v2 }
   0x2   :  { %v17_v1 = vld [vmem:[%s197_s1] sm:$0xff]  ;;  %19 = vmax.xlane.f32.xlu0 %v15_v0 }
   0x3   :  { %8 = vsyncpa [#allocation3], 0  ;;  %v16_v3 = vld [vmem:[%s196_s0 + $0x8] sm:$0xff]  ;;  %36 = vperm.xlu1 %110, %v17_v1   ;;  %111 = vset.pattern.permute.xlu0 %v144_v2  ;;  %v33_v11 = vlaneseq  ;;  %v57_v21 = vld [vmem:[%s198_s2] sm:$0xff]  ;;  %vm55_vm2 = vcmp.eq.s32.totalorder %v17_v1, 0  ;;  %vm82_vm6 = vcmask 130048  }
   0x4   :  { %v18_v4 = vld [vmem:[%s197_s1 + $0x8] sm:$0xff]  ;;  %v59_v22 = vadd.f32 20.0, %v57_v21  ;;  %vm92_vm7 = vcmask 122880  }
   0x5   :  { %v34_v13 = vand.u32 127, %v33_v11  ;;  %v58_v23 = vld [vmem:[%s198_s2 + $0x8] sm:$0xff]  ;;  %vm56_vm3 = vcmp.eq.s32.totalorder %v18_v4, 0  ;;  %v66_v37 = vshrl.u32 %v33_v11, 7  ;;  %s145_s2 = smov [#allocation2]  }
   0x6   :  { %21 = vmax.xlane.f32.xlu0 %v16_v3  ;;  %v61_v27 = vsel %vm55_vm2, 0.0, %v59_v22  ;;  %v60_v28 = vadd.f32 20.0, %v58_v23  ;;  %s100_s22 = sshll.u32 %s145_s2, 4  ;;  %s101_s22 = int_to_ptr.vmem [resolvable:$true] %s100_s22 }
   0x7   :  { %39 = vperm.xlu1 %110, %v18_v4   ;;  %v67_v38 = vadd.s32 8, %v66_v37  ;;  %vm68_vm4 = vcmp.eq.s32.totalorder %v66_v37, %v34_v13  ;;  %s120_s23 = scalar_lea.vmem %s101_s22, 16  ;;  %s124_s24 = scalar_lea.vmem %s101_s22, 32 }
   0x8   :  { %v62_v33 = vsel %vm56_vm3, 0.0, %v60_v28  ;;  %p121_p0 = scmp.ne.s32.totalorder %s101_s22, %s120_s23  ;;  %p125_p1 = scmp.lt.s32.totalorder %s101_s22, %s101_s22 }
   0x9   :  { %vm69_vm5 = vcmp.eq.s32.totalorder %v67_v38, %v34_v13  ;;  %p126_p2 = scmp.lt.s32.totalorder %s124_s24, %s120_s23 }
   0xb   :  { %p127_p3 = por %p126_p2, %p125_p1 }
   0xd   :  { %p128_p4 = pnand %p127_p3, %p121_p0 }
  0x82   :  { %v37_v12 = vpop.permute.xlu1 %36 }
  0x83   :  { %vm41_vm0 = vcmp.eq.s32.totalorder %v34_v13, %v37_v12 }
  0x86   :  { %v40_v15 = vpop.permute.xlu1 %39 }
  0x87   :  { %vm42_vm1 = vcmp.eq.s32.totalorder %v34_v13, %v40_v15 }
  0x8f   :  { %v20_v5 = vpop.xlane.xlu0 %19 }
  0x90   :  { %v23_v6 = vsub.f32 %v15_v0, %v20_v5 }
  0x92   :  { %v25_v7 = vmul.f32 1.442695, %v23_v6  ;;  %v43_v17 = vsel %vm41_vm0, %v23_v6, 0.0 }
  0x93   :  { %v22_v8 = vpop.xlane.xlu0 %21 }
  0x94   :  { %112 = vpow2.f32 %v25_v7  ;;  %v24_v9 = vsub.f32 %v16_v3, %v22_v8 }
  0x96   :  { %v27_v10 = vmul.f32 1.442695, %v24_v9  ;;  %v44_v18 = vsel %vm42_vm1, %v24_v9, 0.0 }
  0x98   :  { %114 = vpow2.f32 %v27_v10 }
  0x9e   :  { %v113_v14 = vpop.eup %112 }
  0x9f   :  { %29 = vadd.xlane.f32.xlu0 %v113_v14 }
  0xa2   :  { %v115_v16 = vpop.eup %114 }
  0xa3   :  { %45 = vadd.xlane.f32.xlu0 %v43_v17  ;;  %31 = vadd.xlane.f32.xlu1 %v115_v16 }
  0xa7   :  { %47 = vadd.xlane.f32.xlu0 %v44_v18 }
 0x12c   :  { %v30_v19 = vpop.xlane.xlu0 %29 }
 0x12d   :  { %116 = vlog2.f32 %v30_v19 }
 0x130   :  { %v32_v20 = vpop.xlane.xlu1 %31  ;;  %v46_v25 = vpop.xlane.xlu0 %45 }
 0x131   :  { %118 = vlog2.f32 %v32_v20 }
 0x134   :  { %v48_v34 = vpop.xlane.xlu0 %47 }
 0x137   :  { %v117_v24 = vpop.eup %116 }
 0x138   :  { %v50_v26 = vmul.f32 0.6931472, %v117_v24 }
 0x13a   :  { %v53_v29 = vsub.f32 %v50_v26, %v46_v25 }
 0x13b   :  { %v119_v30 = vpop.eup %118 }
 0x13c   :  { %v63_v31 = vmul.f32 %v61_v27, %v53_v29  ;;  %v52_v32 = vmul.f32 0.6931472, %v119_v30 }
 0x13e   :  { %v54_v35 = vsub.f32 %v52_v32, %v48_v34  ;;  %72 = vperm.xlu0 %111, %v63_v31  }
 0x140   :  { %v64_v36 = vmul.f32 %v62_v33, %v54_v35 }
 0x142   :  { %77 = vperm.xlu1 %110, %v64_v36  }
 0x1bd   :  { %v73_v39 = vpop.permute.xlu0 %72 }
 0x1be   :  { %v80_v40 = vsel %vm68_vm4, %v73_v39, 0.0 }
 0x1bf   :  { %v83_v43 = vsel %vm82_vm6, %v80_v40, 0.0 }
 0x1c1   :  { %v78_v41 = vpop.permute.xlu1 %77 }
 0x1c2   :  { %v81_v42 = vsel %vm69_vm5, %v78_v41, 0.0 }
 0x1c3   :  { %v84_v44 = vsel %vm82_vm6, %v81_v42, 0.0 }
 0x1c4   :  { %v85_v45 = vadd.f32 %v84_v44, %v83_v43 }
 0x1c6   :  { %v86_v46 = vrot.slane %v85_v45, 4 }
 0x1c8   :  { %v87_v47 = vadd.f32 %v86_v46, %v85_v45 }
 0x1ca   :  { %v88_v48 = vrot.slane %v87_v47, 2 }
 0x1cc   :  { %v89_v49 = vadd.f32 %v88_v48, %v87_v47 }
 0x1ce   :  { %v90_v50 = vrot.slane %v89_v49, 1 }
 0x1d0   :  { %v91_v51 = vadd.f32 %v90_v50, %v89_v49 }
 0x1d2   :  { %93 = vst.msk [vmem:[#allocation2] sm:$0x1] %vm92_vm7, %v91_v51 }
 0x1d3   :  { %131 = shalt.err (!%p128_p4)
}
 0x1d4   :  { %s132_s27 = scalar_lea.hbm %s199_s3, 16 }
 0x1d5   :  { %p133_p5 = scmp.ne.s32.totalorder %s199_s3, %s132_s27  ;;  %p136_p6 = scmp.lt.u32.totalorder %s132_s27, %s199_s3 }
 0x1d7   :  { %p138_p7 = pnand %p136_p6, %p133_p5 }
 0x1d9   :  { %141 = shalt.err (!%p138_p7)
}
 0x1da   :  { %103 = dma.vmem_to_hbm [thread:$0]  %s101_s22, 16, %s199_s3, [#allocation3]  }
 0x1db   :  { %142 = dma.done.wait [#allocation3], 16  }
 0x1dc   :  { %143 = vsyncadd [#allocation3], 4294967280 }
 0x1dd   :  { %107 = vsyncpa [#allocation3], 1 }

</bundles_post_ra>
